<compile_context>
chip_gen: v7x
topology: tpu7x:2x2x1
jax: 0.10.0
libtpu: 0.0.40
codegen_flags: <defaults>
</compile_context>

<pallas_src>
import functools
import math

import jax
import jax.numpy as jnp
from jax.experimental import pallas as pl
from jax.experimental.pallas import tpu as pltpu


_BB_CAP = 256          # max batch entries fused into one grid step
_MIN_MXU_DIM = 128     # if M, N, K are ALL below this -> XLA fallback


def _probe_buffered():
    """Feature-detect pl.Buffered / BlockSpec(pipeline_mode=...)."""
    try:
        buffered = getattr(pl, "Buffered", None)
        if buffered is None:
            return False
        pl.BlockSpec((8, 128), lambda i: (i, 0), pipeline_mode=buffered(3))
        return True
    except Exception:
        return False


_HAS_BUFFERED = _probe_buffered()


@functools.lru_cache(maxsize=None)
def _tpu_config():
    """Generation-aware VMEM budget / tile caps."""
    vmem = None
    try:
        info = pltpu.get_tpu_info()
        vmem = getattr(info, "vmem_capacity_bytes", None)
    except Exception:
        vmem = None
    if not vmem or vmem <= 0:
        vmem = 64 * 1024 * 1024                    # conservative (v7x-sized)
    if vmem >= 100 * 1024 * 1024:                  # v5e / v6e: 128 MiB VMEM
        return {"vmem_limit": 64 << 20, "block_budget": 40 << 20, "cap": 1024}
    # v7x (64 MiB VMEM, 2 TensorCores) or unknown backend.
    return {"vmem_limit": 32 << 20, "block_budget": 20 << 20, "cap": 512}


def _pick_tile(dim, cap, sublane_ok=False):
    """Largest tile <= cap dividing `dim` (full extent when dim <= cap).

    Returns (tile, padded_dim); padded_dim > dim only in the rare fallback
    where no (8,128)-aligned divisor exists.
    """
    if dim <= cap:
        return dim, dim
    t = (cap // 128) * 128
    while t >= 128:
        if dim % t == 0:
            return t, dim
        t -= 128
    if sublane_ok:                                  # M (sublane) dim: 8-aligned OK
        t = (cap // 8) * 8
        while t >= 8:
            if dim % t == 0:
                return t, dim
            t -= 8
    # Rare fallback: zero-padding keeps the contraction exact (just slower).
    return cap, pl.cdiv(dim, cap) * cap


def _pick_bb(nb, tm, tn, tk, a_bytes, b_bytes, o_bytes, acc_bytes, budget):
    """Largest divisor of nb (<= _BB_CAP) whose double-buffered blocks fit."""
    per_entry = (2 * tm * tk * a_bytes + 2 * tk * tn * b_bytes
                 + 2 * tm * tn * o_bytes + acc_bytes)
    best = 1
    for bb in range(1, min(nb, _BB_CAP) + 1):
        if nb % bb:
            continue
        if bb * per_entry <= budget:
            best = bb
    return best


def _make_kernel(bb, multi_k, use_scratch):
    def partial_product(a_ref, b_ref):
        if bb == 1:
            return jnp.dot(a_ref[0], b_ref[0], preferred_element_type=jnp.float32)
        return jnp.einsum("bmk,bkn->bmn", a_ref[...], b_ref[...],
                          preferred_element_type=jnp.float32)

    def store(ref, val):
        if bb == 1:
            ref[0] = val.astype(ref.dtype)
        else:
            ref[...] = val.astype(ref.dtype)

    def accumulate(ref, val):
        if bb == 1:
            ref[0] += val
        else:
            ref[...] += val

    if not multi_k:
        # Single K slab (preferred on v7x): no init/writeback phases at all.
        def kernel(a_ref, b_ref, o_ref):
            store(o_ref, partial_product(a_ref, b_ref))
        return kernel

    if not use_scratch:
        # f32 output: accumulate straight into the resident output block
        # (o_map ignores the k axis) -- saves bb*tm*tn*4 B of VMEM scratch.
        def kernel(a_ref, b_ref, o_ref):
            @pl.when(pl.program_id(3) == 0)
            def _init():
                o_ref[...] = jnp.zeros_like(o_ref)

            accumulate(o_ref, partial_product(a_ref, b_ref))
        return kernel

    def kernel(a_ref, b_ref, o_ref, acc_ref):
        @pl.when(pl.program_id(3) == 0)
        def _init():
            acc_ref[...] = jnp.zeros_like(acc_ref)

        accumulate(acc_ref, partial_product(a_ref, b_ref))

        @pl.when(pl.program_id(3) == pl.num_programs(3) - 1)
        def _done():
            o_ref[...] = acc_ref[...].astype(o_ref.dtype)

    return kernel


def _pallas_bmm(a, b, out_dtype, nb, a_bcast, flops, bytes_accessed):
    """a: (1 if a_bcast else nb, M, K), b: (nb, K, N) -> (nb, M, N)."""
    cfg = _tpu_config()
    cap = cfg["cap"]
    _, M, K = a.shape
    _, _, N = b.shape

    tm, Mp = _pick_tile(M, cap, sublane_ok=True)
    tn, Np = _pick_tile(N, cap)
    tk, Kp = _pick_tile(K, cap)

    # Rare fallback only (tiles above divide the true dims for SqueezeBERT
    # shapes: seq, hidden=768, head_dim=64 -> no HBM pad/slice copies).
    if (Mp, Kp) != (M, K):
        a = jnp.pad(a, ((0, 0), (0, Mp - M), (0, Kp - K)))
    if (Kp, Np) != (K, N):
        b = jnp.pad(b, ((0, 0), (0, Kp - K), (0, Np - N)))

    grid_k = Kp // tk
    multi_k = grid_k > 1
    out_is_f32 = jnp.dtype(out_dtype) == jnp.dtype(jnp.float32)
    use_scratch = multi_k and not out_is_f32

    a_bytes = a.dtype.itemsize
    b_bytes = b.dtype.itemsize
    o_bytes = jnp.dtype(out_dtype).itemsize
    acc_bytes = tm * tn * 4 if use_scratch else 0

    if a_bcast:
        # Broadcast LHS stays implicit: one (1, tm, tk) block, constant batch
        # index in the index_map, no in-kernel broadcast_to.
        bb = 1
    else:
        bb = _pick_bb(nb, tm, tn, tk, a_bytes, b_bytes, o_bytes, acc_bytes,
                      cfg["block_budget"])

    grid_b, grid_m, grid_n = nb // bb, Mp // tm, Np // tn

    # Keep >= 2 iterations on a parallel axis so both v7x TensorCores get work.
    if grid_b * grid_m * grid_n < 2:
        if bb > 1:
            for cand in range(bb - 1, 0, -1):
                if nb % cand == 0:
                    bb = cand
                    break
        elif tm > 8 and Mp % (tm // 2) == 0 and (tm // 2) % 8 == 0:
            tm //= 2
        elif tn > 128 and Np % (tn // 2) == 0 and (tn // 2) % 128 == 0:
            tn //= 2
        grid_b, grid_m, grid_n = nb // bb, Mp // tm, Np // tn

    a_bdim = 1 if a_bcast else bb

    def a_map(ib, im, in_, ik):
        return (0 if a_bcast else ib, im, ik)

    def b_map(ib, im, in_, ik):
        return (ib, ik, in_)

    def o_map(ib, im, in_, ik):
        return (ib, im, in_)

    # Deeper pipelining on the K-streamed operand when the k loop is long and
    # the per-slab DMA is small (cheap VMEM, hides exposed DMA latency).
    b_block_bytes = bb * tk * tn * b_bytes
    per_entry = (2 * tm * tk * a_bytes + 2 * tk * tn * b_bytes
                 + 2 * tm * tn * o_bytes + acc_bytes)
    b_spec_kwargs = {}
    if (_HAS_BUFFERED and grid_k >= 4 and b_block_bytes <= 256 * 1024
            and bb * per_entry + b_block_bytes <= cfg["block_budget"]):
        b_spec_kwargs["pipeline_mode"] = pl.Buffered(3)

    in_specs = [
        pl.BlockSpec((a_bdim, tm, tk), a_map),
        pl.BlockSpec((bb, tk, tn), b_map, **b_spec_kwargs),
    ]
    out_spec = pl.BlockSpec((bb, tm, tn), o_map)
    scratch = [pltpu.VMEM((bb, tm, tn), jnp.float32)] if use_scratch else []

    out = pl.pallas_call(
        _make_kernel(bb, multi_k, use_scratch),
        out_shape=jax.ShapeDtypeStruct((nb, Mp, Np), out_dtype),
        grid_spec=pltpu.PrefetchScalarGridSpec(
            num_scalar_prefetch=0,
            grid=(grid_b, grid_m, grid_n, grid_k),
            in_specs=in_specs,
            out_specs=out_spec,
            scratch_shapes=scratch,
        ),
        compiler_params=pltpu.CompilerParams(
            dimension_semantics=("parallel", "parallel", "parallel", "arbitrary"),
            vmem_limit_bytes=cfg["vmem_limit"],
        ),
        cost_estimate=pl.CostEstimate(
            flops=int(flops), transcendentals=0, bytes_accessed=int(bytes_accessed)
        ),
    )(a, b)

    if (Mp, Np) != (M, N):
        out = out[:, :M, :N]
    return out


def matmul_wrapper(mat1: jax.Array, mat2: jax.Array, cast_to_bf16: bool = False):
    """Pallas equivalent of MatMulWrapper.forward: torch.matmul(mat1, mat2).

    cast_to_bf16 is an optional throughput mode (NOT bit-equivalent to an f32
    torch.matmul): the MXU is natively bf16 on v5e / v6e / v7x, so feeding bf16
    inputs (with f32 in-kernel accumulation) roughly 2-3x the MXU throughput
    and halves HBM read traffic -- recommended on v5e in particular.
    """
    assert mat1.ndim >= 2 and mat2.ndim >= 2, "MatMulWrapper expects >=2-D inputs"
    M, K = mat1.shape[-2], mat1.shape[-1]
    K2, N = mat2.shape[-2], mat2.shape[-1]
    assert K == K2, f"inner dimensions must match: {K} vs {K2}"

    batch_shape = jnp.broadcast_shapes(mat1.shape[:-2], mat2.shape[:-2])
    out_dtype = jnp.result_type(mat1.dtype, mat2.dtype)
    out_shape = batch_shape + (M, N)
    BH = math.prod(batch_shape)

    # Degenerate shapes: nothing to compute (or pure-zero contraction).
    if BH == 0 or M == 0 or N == 0 or K == 0:
        return jnp.zeros(out_shape, out_dtype)

    # TODO(synk): integer / f16 / f64 matmuls stay on the XLA path (f32 MXU
    # accumulation would change integer semantics; v7x MXU has no int mode).
    if jnp.dtype(out_dtype) not in (jnp.dtype(jnp.float32), jnp.dtype(jnp.bfloat16)):
        return jnp.matmul(mat1, mat2)

    # Tiny per-entry GEMMs (< one MXU tile on every dim): pallas_call fixed
    # overhead dominates and XLA's fused batched dot is faster.
    if M < _MIN_MXU_DIM and N < _MIN_MXU_DIM and K < _MIN_MXU_DIM:
        return jnp.matmul(mat1, mat2)

    if cast_to_bf16 and mat1.dtype == jnp.float32 and mat2.dtype == jnp.float32:
        mat1 = mat1.astype(jnp.bfloat16)
        mat2 = mat2.astype(jnp.bfloat16)
        # out_dtype stays f32 (f32-shaped result, bf16-input precision).

    flops = 2 * BH * M * N * K
    bytes_accessed = (
        mat1.size * mat1.dtype.itemsize
        + mat2.size * mat2.dtype.itemsize
        + BH * M * N * jnp.dtype(out_dtype).itemsize
    )

    nba = math.prod(mat1.shape[:-2])
    nbb = math.prod(mat2.shape[:-2])

    if nbb == 1:
        # Shared (broadcast) rhs, e.g. a weight: fold the batch into M and run
        # one large tiled GEMM instead of BH small ones.
        a = mat1.reshape(1, nba * M, K)
        b = mat2.reshape(1, K, N)
        out = _pallas_bmm(a, b, out_dtype, nb=1, a_bcast=False,
                          flops=flops, bytes_accessed=bytes_accessed)
        return out.reshape(out_shape)

    # Batched rhs.
    a_bcast = nba == 1
    if not a_bcast and nba != BH:
        mat1 = jnp.broadcast_to(mat1, batch_shape + (M, K))   # rare partial broadcast
        nba = BH
    if nbb != BH:
        mat2 = jnp.broadcast_to(mat2, batch_shape + (K, N))   # rare partial broadcast
        nbb = BH

    a = mat1.reshape(nba, M, K)
    b = mat2.reshape(nbb, K, N)
    out = _pallas_bmm(a, b, out_dtype, nb=BH, a_bcast=a_bcast,
                      flops=flops, bytes_accessed=bytes_accessed)
    return out.reshape(out_shape)


if __name__ == "__main__":
    key = jax.random.PRNGKey(0)
    keys = jax.random.split(key, 8)

    def bf16_exact(k, shape):
        # bf16-exact f32 values: MXU bf16 passes introduce no input error, so
        # the Pallas kernel and the XLA reference agree tightly.
        x = jax.random.normal(k, shape, dtype=jnp.float32)
        return x.astype(jnp.bfloat16).astype(jnp.float32)

    B, H, S, D = 2, 4, 128, 64

    # 1) Attention-score matmul [B,H,S,D] x [B,H,D,S] (batched, fused bb).
    q = bf16_exact(keys[0], (B, H, S, D))
    kt = bf16_exact(keys[1], (B, H, D, S))
    scores = jax.block_until_ready(matmul_wrapper(q, kt))
    assert scores.shape == (B, H, S, S), scores.shape
    assert jnp.allclose(scores, jnp.matmul(q, kt), atol=1e-2, rtol=1e-3), "scores mismatch"

    # 2) Context matmul [B,H,S,S] x [B,H,S,D] (narrow N = head_dim, see TODO).
    attn = bf16_exact(keys[2], (B, H, S, S))
    v = bf16_exact(keys[3], (B, H, S, D))
    ctx = jax.block_until_ready(matmul_wrapper(attn, v))
    assert ctx.shape == (B, H, S, D), ctx.shape
    assert jnp.allclose(ctx, jnp.matmul(attn, v), atol=1e-2, rtol=1e-3), "context mismatch"

    # 3) Shared weight (folded single GEMM) with K > tile cap -> exercises the
    #    multi-K direct-accumulation-into-output path.
    Kbig, Nout = 1536, 256
    x = bf16_exact(keys[4], (B, S, Kbig))
    w = bf16_exact(keys[5], (Kbig, Nout))
    y = jax.block_until_ready(matmul_wrapper(x, w))
    assert y.shape == (B, S, Nout), y.shape
    assert jnp.allclose(y, jnp.matmul(x, w), atol=1e-2, rtol=1e-3), "weight mismatch"

    # 4) Native bf16 inputs with multi-K -> exercises the f32 scratch path.
    xb, wb = x.astype(jnp.bfloat16), w.astype(jnp.bfloat16)
    yb = jax.block_until_ready(matmul_wrapper(xb, wb))
    assert yb.dtype == jnp.bfloat16
    assert jnp.allclose(yb.astype(jnp.float32),
                        jnp.matmul(xb, wb).astype(jnp.float32),
                        atol=2e-2, rtol=2e-2), "bf16 mismatch"

    # 5) Broadcast lhs over the batch dims (constant index_map, no HBM copy).
    q2 = bf16_exact(keys[6], (S, D))
    ob = jax.block_until_ready(matmul_wrapper(q2, kt))
    assert ob.shape == (B, H, S, S), ob.shape
    assert jnp.allclose(ob, jnp.matmul(q2, kt), atol=1e-2, rtol=1e-3), "broadcast mismatch"

    # 6) Small per-entry shapes route to the XLA fallback.
    s1 = bf16_exact(keys[7], (2, 4, 8, 32))
    s2 = bf16_exact(keys[0], (2, 4, 32, 16))
    small = jax.block_until_ready(matmul_wrapper(s1, s2))
    assert jnp.allclose(small, jnp.matmul(s1, s2), atol=1e-3, rtol=1e-3), "small mismatch"

    print("KERNEL_OK")
</pallas_src>

<mosaic_0001>
module attributes {stable_mosaic.version = 11 : i64} {
  func.func @kernel(%arg0: i32, %arg1: i32, %arg2: i32, %arg3: i32, %arg4: memref<4x128x64xf32, #tpu.memory_space<vmem>>, %arg5: memref<4x64x128xf32, #tpu.memory_space<vmem>>, %arg6: memref<4x128x128xf32, #tpu.memory_space<vmem>>) attributes {dimension_semantics = [#tpu.dimension_semantics<parallel>, #tpu.dimension_semantics<parallel>, #tpu.dimension_semantics<parallel>, #tpu.dimension_semantics<arbitrary>], iteration_bounds = array<i64: 2, 1, 1, 1>, scalar_prefetch = 0 : i64, scratch_operands = 0 : i64, tpu.core_type = #tpu.core_type<tc>, window_params = [{transform_indices = @transform_0, window_bounds = array<i64: 4, 128, 64>}, {transform_indices = @transform_1, window_bounds = array<i64: 4, 64, 128>}, {transform_indices = @transform_2, window_bounds = array<i64: 4, 128, 128>}]} {
    %c0 = arith.constant 0 : index
    %c0_0 = arith.constant 0 : index
    %c0_1 = arith.constant 0 : index
    %0 = vector.load %arg4[%c0, %c0_0, %c0_1] : memref<4x128x64xf32, #tpu.memory_space<vmem>>, vector<4x128x64xf32>
    %c0_2 = arith.constant 0 : index
    %c0_3 = arith.constant 0 : index
    %c0_4 = arith.constant 0 : index
    %1 = vector.load %arg5[%c0_2, %c0_3, %c0_4] : memref<4x64x128xf32, #tpu.memory_space<vmem>>, vector<4x64x128xf32>
    "tpu.trace_start"() <{level = 10 : i32, message = "bmk,bkn->bmn"}> : () -> ()
    %cst = arith.constant dense<0.000000e+00> : vector<4x128x128xf32>
    %2 = tpu.matmul %0, %1, %cst {dimension_numbers = #tpu.dot_dimension_numbers<[2], [1], [1], [2], [0, 0, 0, 1, 1, 2], [0], [0]>} : vector<4x128x64xf32>, vector<4x64x128xf32>, vector<4x128x128xf32> -> vector<4x128x128xf32>
    "tpu.trace_stop"() : () -> ()
    %c0_5 = arith.constant 0 : index
    %c0_6 = arith.constant 0 : index
    %c0_7 = arith.constant 0 : index
    %3 = vector.load %arg6[%c0_5, %c0_6, %c0_7] : memref<4x128x128xf32, #tpu.memory_space<vmem>>, vector<4x128x128xf32>
    tpu.vector_store %arg6[%c0_5, %c0_6, %c0_7], %2 {strides = array<i32>} : memref<4x128x128xf32, #tpu.memory_space<vmem>>, vector<4x128x128xf32>,
    return
  }
  func.func @transform_0(%arg0: i32, %arg1: i32, %arg2: i32, %arg3: i32) -> (i32, i32, i32) {
    %c0_i32 = arith.constant 0 : i32
    return %arg0, %arg1, %arg3 : i32, i32, i32
  }
  func.func @transform_1(%arg0: i32, %arg1: i32, %arg2: i32, %arg3: i32) -> (i32, i32, i32) {
    %c0_i32 = arith.constant 0 : i32
    return %arg0, %arg3, %arg2 : i32, i32, i32
  }
  func.func @transform_2(%arg0: i32, %arg1: i32, %arg2: i32, %arg3: i32) -> (i32, i32, i32) {
    %c0_i32 = arith.constant 0 : i32
    return %arg0, %arg1, %arg2 : i32, i32, i32
  }
}

</mosaic_0001>

<bundles_post_ra>
// kernel: tpu_custom_call.1
= control target key start
LH: loop header
LB: loop body
LE: loop exit
PB: predicated region body
PF: predicated region fallthrough
CT: control target
= control target key end

     0   :  { %7 = vsyncpa [#allocation3], 0  ;;  %s2232_s0 = inlined_call_operand.vmem [shape: f32[8,128,64], index: 0, kind: input, shape index: {}]   ;;  %s2233_s1 = inlined_call_operand.vmem [shape: f32[8,64,128], index: 1, kind: input, shape index: {}]   ;;  %s2234_s2 = inlined_call_operand.hbm [shape: f32[8,128,128], index: 2, kind: output, shape index: {}]  }
   0x1   :  { %9 = vsyncpa [#allocation3 + $0x1], 0  ;;  %s1880_s9 = smov 0   ;;  %s1882_s10 = smov 0  }
   0x2   :  { %s1884_s11 = smov 0   ;;  %s1886_s12 = smov 0  }
   0x3   :  { %s1888_s13 = smov 0   ;;  %s1890_s14 = smov 0  }
   0x4 LB: > { %s1319_s15 = sadd.s32 4294967295, %s1860_s14   ;;  %s1320_s16 = sadd.s32 4294967294, %s1860_s14   ;;  %s1860_s14 = sphi %s1890_s14, %s15_s14   ;;  %s1856_s13 = sphi %s1888_s13, %s2241_s13   ;;  %s1852_s12 = sphi %s1886_s12, %s2240_s12   ;;  %s1848_s11 = sphi %s1884_s11, %s2239_s11   ;;  %s1844_s10 = sphi %s1882_s10, %s2238_s10   ;;  %s1840_s9 = sphi %s1880_s9, %s2237_s9  }
   0x5   : > { %s41_s17 = sadd.s32 1, %s1856_s13  ;;  %s112_s18 = sadd.s32 1, %s1848_s11 }
   0x6   : > { %p43_p0 = scmp.ge.s32.totalorder %s41_s17, 2  ;;  %p122_p1 = scmp.ne.s32.totalorder %s1848_s11, %s1844_s10 }
   0x7   : > { %p123_p2 = scmp.eq.s32.totalorder %s1319_s15, 1  ;;  %p128_p3 = scmp.ne.s32.totalorder %s1844_s10, %s1840_s9 }
   0x8   : > { %s2243_s17 = smov (%p43_p0, %s41_s17), 0  ;;  %p129_p5 = scmp.eq.s32.totalorder %s1320_s16, 1 }
   0x9   : > { %p1920_p4 = por %p123_p2, %p122_p1  ;;  %s105_s20 = ssub.s32 %s1856_s13, %s2243_s17 }
   0xa   : > { %p1323_p6 = scmp.ge.s32.totalorder %s1860_s14, 1  ;;  %p110_p7 = scmp.eq.s32.totalorder %s105_s20, 0 }
   0xb   : > { %p1927_p8 = por %p129_p5, %p128_p3  ;;  %p183_p9 = scmp.lt.s32.totalorder %s1860_s14, 3 }
   0xc   : > { %s1933_s22 = scalar_select %p110_p7, %s1848_s11, %s112_s18  }
   0xd   : > { %p184_p10 = pnand %p1323_p6, %p183_p9 }
   0xe   : > { %s1325_s23 = sshll.u32 (!%p184_p10), %s1852_s12, 2  ;;  %vm354_vm0 = vcmask (!%p184_p10), 523264   ;;  %s223_s4 = sand.u32 (!%p184_p10), 1, %s1844_s10  }
   0xf   : > { %187 = sbr.rel (%p184_p10) target bundleno = 333 (0x14d), region = 28  ;;  %p228_p11 = scmp.lt.s32.totalorder (!%p184_p10), %s1325_s23, 7 }
  0x10   : > { %s1324_s5 = sshll.u32 (!%p184_p10), %s223_s4, 9  ;;  %s1404_s7 = sshll.u32 (!%p184_p10), %s1852_s12, 13 }
  0x11   : > { %s2109_s6 = scalar_lea.vmem (!%p184_p10), [#allocation2], %s1324_s5  ;;  %s2176_s18 = scalar_lea.hbm (!%p184_p10), %s2234_s2, %s1404_s7 }
  0x12   : > { %s1209_s8 = sshll.u32 (!%p184_p10), %s2109_s6, 4  ;;  %s2186_s12 = scalar_lea.sflag (!%p184_p10), [#allocation3], %s223_s4  ;;  %s2178_s8 = int_to_ptr.vmem [resolvable:$true] %s1209_s8 }
  0x13   : > { %s1782_s20 = scalar_lea.vmem (!%p184_p10), %s2178_s8, 8192 }
  0x14   : > { %p1783_p12 = scmp.ne.s32.totalorder (!%p184_p10), %s2178_s8, %s1782_s20 }
  0x16   : > { %s2245_s23 = smov (!%p228_p11, %s1325_s23), 7  ;;  %p1784_p13 = pnand %p1783_p12, %p1920_p4 }
  0x17   : > { %s1402_s24 = sshll.u32 %s2245_s23, 6  ;;  %s1401_s25 = sshll.u32 %s2245_s23, 7 }
  0x18   : > { %s1939_s28 = scalar_lea.vmem %s2233_s1, %s1402_s24  ;;  %s1950_s3 = scalar_lea.vmem %s2232_s0, %s1401_s25 }
  0x19   : > { %v322_v0 = vld [vmem:[%s1939_s28] sm:$0xff]  ;;  %v323_v1 = vld [vmem:[%s1939_s28 + $0x8] sm:$0xff]  ;;  %v324_v5 = vld [vmem:[%s1939_s28 + $0x10] sm:$0xff]  ;;  %p1785_p0 = pneg %p1784_p13  ;;  %s1862_s23 = smov [#allocation2]  }
  0x1a   : > { %v330_v2 = vld [vmem:[%s1939_s28 + $0x40] sm:$0xff]  ;;  %v1661_v3 = vpack.c.bf16 %v323_v1, %v322_v0  ;;  %v331_v4 = vld [vmem:[%s1939_s28 + $0x48] sm:$0xff]  ;;  %v325_v6 = vld [vmem:[%s1939_s28 + $0x18] sm:$0xff]  ;;  %s1786_s24 = sshll.u32 %s1862_s23, 4  ;;  %s1787_s24 = int_to_ptr.vmem [resolvable:$false] %s1786_s24 }
  0x1b   : > { %v1677_v7 = vpack.c.bf16 %v331_v4, %v330_v2  ;;  %v1665_v8 = vpack.c.bf16 %v325_v6, %v324_v5  ;;  %v332_v9 = vld [vmem:[%s1939_s28 + $0x50] sm:$0xff]  ;;  %v333_v10 = vld [vmem:[%s1939_s28 + $0x58] sm:$0xff]  ;;  %v326_v11 = vld [vmem:[%s1939_s28 + $0x20] sm:$0xff]  ;;  %s1788_s25 = scalar_lea.vmem %s1787_s24, 16384  ;;  %p1789_p1 = scmp.lt.s32.totalorder %s2178_s8, %s1787_s24 }
  0x1c   : > { %1662 = vmatprep.subr.bf16.mxu0 %v1661_v3  ;;  %v1681_v12 = vpack.c.bf16 %v333_v10, %v332_v9  ;;  %v327_v13 = vld [vmem:[%s1939_s28 + $0x28] sm:$0xff]  ;;  %v334_v14 = vld [vmem:[%s1939_s28 + $0x60] sm:$0xff]  ;;  %v328_v20 = vld [vmem:[%s1939_s28 + $0x30] sm:$0xff]  ;;  %p1790_p2 = scmp.lt.s32.totalorder %s1788_s25, %s1782_s20 }
  0x1d   : > { %v335_v15 = vld [vmem:[%s1939_s28 + $0x68] sm:$0xff]  ;;  %1678 = vmatprep.subr.bf16.mxu1 %v1677_v7  ;;  %1664 = vmatpush3.bf16.msra.mxu0 %v1661_v3  ;;  %v1669_v16 = vpack.c.bf16 %v327_v13, %v326_v11  ;;  %v258_v17 = vld [vmem:[%s1950_s3] sm:$0xff]  ;;  %v329_v21 = vld [vmem:[%s1939_s28 + $0x38] sm:$0xff] }
  0x1e   : > { %1680 = vmatpush3.bf16.msra.mxu1 %v1677_v7  ;;  %1666 = vmatprep.subr.bf16.mxu0 %v1665_v8  ;;  %v274_v18 = vld [vmem:[%s1950_s3 + $0x80] sm:$0xff]  ;;  %v1685_v19 = vpack.c.bf16 %v335_v15, %v334_v14  ;;  %v336_v22 = vld [vmem:[%s1939_s28 + $0x70] sm:$0xff]  ;;  %v337_v23 = vld [vmem:[%s1939_s28 + $0x78] sm:$0xff]  ;;  %v1673_v24 = vpack.c.bf16 %v329_v21, %v328_v20  ;;  %p1791_p3 = por %p1790_p2, %p1789_p1 }
  0x1f   : > { %1682 = vmatprep.subr.bf16.mxu1 %v1681_v12  ;;  %1517 = vmatprep.mubr.msk.f32.mxu0 %vm354_vm0, %v258_v17  ;;  %v1689_v25 = vpack.c.bf16 %v337_v23, %v336_v22  ;;  %v338_v26 = vld [vmem:[%s1939_s28 + $0x80] sm:$0xff]  ;;  %v339_v27 = vld [vmem:[%s1939_s28 + $0x88] sm:$0xff]  ;;  %v340_v32 = vld [vmem:[%s1939_s28 + $0x90] sm:$0xff] }
  0x20   : > { %1557 = vmatprep.mubr.msk.f32.mxu1 %vm354_vm0, %v274_v18  ;;  %v346_v28 = vld [vmem:[%s1939_s28 + $0xc0] sm:$0xff]  ;;  %v347_v29 = vld [vmem:[%s1939_s28 + $0xc8] sm:$0xff]  ;;  %v1693_v30 = vpack.c.bf16 %v339_v27, %v338_v26  ;;  %v341_v33 = vld [vmem:[%s1939_s28 + $0x98] sm:$0xff]  ;;  %p1792_p5 = pnand %p1791_p3, %p1785_p0 }
  0x21   : > { %1668 = vmatpush3.bf16.msra.mxu0 %v1665_v8  ;;  %v1709_v31 = vpack.c.bf16 %v347_v29, %v346_v28  ;;  %v259_v34 = vld [vmem:[%s1950_s3 + $0x8] sm:$0xff]  ;;  %v348_v35 = vld [vmem:[%s1939_s28 + $0xd0] sm:$0xff]  ;;  %v349_v36 = vld [vmem:[%s1939_s28 + $0xd8] sm:$0xff]  ;;  %v1697_v39 = vpack.c.bf16 %v341_v33, %v340_v32 }
  0x22   : > { %1684 = vmatpush3.bf16.msra.mxu1 %v1681_v12  ;;  %1670 = vmatprep.subr.bf16.mxu0 %v1669_v16  ;;  %v275_v37 = vld [vmem:[%s1950_s3 + $0x88] sm:$0xff]  ;;  %v260_v38 = vld [vmem:[%s1950_s3 + $0x10] sm:$0xff]  ;;  %v1713_v41 = vpack.c.bf16 %v349_v36, %v348_v35  ;;  %v342_v42 = vld [vmem:[%s1939_s28 + $0xa0] sm:$0xff] }
  0x23   : > { %1686 = vmatprep.subr.bf16.mxu1 %v1685_v19  ;;  %v276_v40 = vld [vmem:[%s1950_s3 + $0x90] sm:$0xff]  ;;  %v343_v43 = vld [vmem:[%s1939_s28 + $0xa8] sm:$0xff]  ;;  %v261_v44 = vld [vmem:[%s1950_s3 + $0x18] sm:$0xff] }
  0x24   : > { %v350_v45 = vld [vmem:[%s1939_s28 + $0xe0] sm:$0xff]  ;;  %v351_v46 = vld [vmem:[%s1939_s28 + $0xe8] sm:$0xff]  ;;  %v277_v47 = vld [vmem:[%s1950_s3 + $0x98] sm:$0xff]  ;;  %v1701_v50 = vpack.c.bf16 %v343_v43, %v342_v42 }
  0x25   : > { %1672 = vmatpush3.bf16.msra.mxu0 %v1669_v16  ;;  %v262_v48 = vld [vmem:[%s1950_s3 + $0x20] sm:$0xff]  ;;  %v1717_v51 = vpack.c.bf16 %v351_v46, %v350_v45  ;;  %v344_v52 = vld [vmem:[%s1939_s28 + $0xb0] sm:$0xff]  ;;  %v345_v53 = vld [vmem:[%s1939_s28 + $0xb8] sm:$0xff] }
  0x26   : > { %1688 = vmatpush3.bf16.msra.mxu1 %v1685_v19  ;;  %1674 = vmatprep.subr.bf16.mxu0 %v1673_v24  ;;  %v278_v49 = vld [vmem:[%s1950_s3 + $0xa0] sm:$0xff]  ;;  %v263_v54 = vld [vmem:[%s1950_s3 + $0x28] sm:$0xff]  ;;  %v352_v55 = vld [vmem:[%s1939_s28 + $0xf0] sm:$0xff]  ;;  %v1705_v60 = vpack.c.bf16 %v345_v53, %v344_v52 }
  0x27   : > { %1690 = vmatprep.subr.bf16.mxu1 %v1689_v25  ;;  %v353_v56 = vld [vmem:[%s1939_s28 + $0xf8] sm:$0xff]  ;;  %v279_v57 = vld [vmem:[%s1950_s3 + $0xa8] sm:$0xff]  ;;  %v264_v58 = vld [vmem:[%s1950_s3 + $0x30] sm:$0xff] }
  0x28   : > { %v280_v59 = vld [vmem:[%s1950_s3 + $0xb0] sm:$0xff]  ;;  %v1721_v61 = vpack.c.bf16 %v353_v56, %v352_v55  ;;  %v265_v62 = vld [vmem:[%s1950_s3 + $0x38] sm:$0xff]  ;;  %v266_v0 = vld [vmem:[%s1950_s3 + $0x40] sm:$0xff] }
  0x29   : > { %1676 = vmatpush3.bf16.msra.mxu0 %v1673_v24  ;;  %v281_v63 = vld [vmem:[%s1950_s3 + $0xb8] sm:$0xff]  ;;  %v282_v1 = vld [vmem:[%s1950_s3 + $0xc0] sm:$0xff]  ;;  %v267_v2 = vld [vmem:[%s1950_s3 + $0x48] sm:$0xff] }
  0x2a   : > { %1692 = vmatpush3.bf16.msra.mxu1 %v1689_v25  ;;  %1694 = vmatprep.subr.bf16.mxu0 %v1693_v30  ;;  %v283_v3 = vld [vmem:[%s1950_s3 + $0xc8] sm:$0xff]  ;;  %v268_v4 = vld [vmem:[%s1950_s3 + $0x50] sm:$0xff]  ;;  %v269_v6 = vld [vmem:[%s1950_s3 + $0x58] sm:$0xff] }
  0x2b   : > { %1710 = vmatprep.subr.bf16.mxu1 %v1709_v31  ;;  %v284_v5 = vld [vmem:[%s1950_s3 + $0xd0] sm:$0xff]  ;;  %v285_v7 = vld [vmem:[%s1950_s3 + $0xd8] sm:$0xff]  ;;  %v270_v8 = vld [vmem:[%s1950_s3 + $0x60] sm:$0xff] }
  0x2c   : > { %1518 = vmatmul.mubr.msk.f32.vlgmr.msra.gmra.mrb[0].mxu0 %vm354_vm0, %v259_v34  ;;  %v286_v9 = vld [vmem:[%s1950_s3 + $0xe0] sm:$0xff]  ;;  %v271_v10 = vld [vmem:[%s1950_s3 + $0x68] sm:$0xff]  ;;  %v272_v12 = vld [vmem:[%s1950_s3 + $0x70] sm:$0xff] }
  0x2d   : > { %1558 = vmatmul.mubr.msk.f32.vlgmr.msra.gmra.mrb[0].mxu1 %vm354_vm0, %v275_v37  ;;  %1696 = vmatpush3.bf16.msra.mxu0 %v1693_v30  ;;  %v287_v11 = vld [vmem:[%s1950_s3 + $0xe8] sm:$0xff]  ;;  %v288_v13 = vld [vmem:[%s1950_s3 + $0xf0] sm:$0xff]  ;;  %v273_v14 = vld [vmem:[%s1950_s3 + $0x78] sm:$0xff] }
  0x2e   : > { %1712 = vmatpush3.bf16.msra.mxu1 %v1709_v31  ;;  %1520 = vmatprep.mubr.msk.f32.mxu0 %vm354_vm0, %v260_v38  ;;  %v289_v15 = vld [vmem:[%s1950_s3 + $0xf8] sm:$0xff]  ;;  %v290_v16 = vld [vmem:[%s1950_s3 + $0x100] sm:$0xff]  ;;  %v291_v18 = vld [vmem:[%s1950_s3 + $0x108] sm:$0xff] }
  0x2f   : > { %1560 = vmatprep.mubr.msk.f32.mxu1 %vm354_vm0, %v276_v40  ;;  %1698 = vmatprep.subr.bf16.mxu0 %v1697_v39  ;;  %v306_v17 = vld [vmem:[%s1950_s3 + $0x180] sm:$0xff]  ;;  %v307_v19 = vld [vmem:[%s1950_s3 + $0x188] sm:$0xff]  ;;  %v292_v20 = vld [vmem:[%s1950_s3 + $0x110] sm:$0xff] }
  0x30   : > { %1521 = vmatmul.mubr.msk.f32.gmra.mrb[2].mxu0 %vm354_vm0, %v261_v44  ;;  %1714 = vmatprep.subr.bf16.mxu1 %v1713_v41  ;;  %v308_v21 = vld [vmem:[%s1950_s3 + $0x190] sm:$0xff]  ;;  %v293_v22 = vld [vmem:[%s1950_s3 + $0x118] sm:$0xff]  ;;  %v294_v24 = vld [vmem:[%s1950_s3 + $0x120] sm:$0xff] }
  0x31   : > { %1561 = vmatmul.mubr.msk.f32.gmra.mrb[2].mxu1 %vm354_vm0, %v277_v47  ;;  %1523 = vmatprep.mubr.msk.f32.mxu0 %vm354_vm0, %v262_v48  ;;  %v309_v23 = vld [vmem:[%s1950_s3 + $0x198] sm:$0xff]  ;;  %v310_v25 = vld [vmem:[%s1950_s3 + $0x1a0] sm:$0xff]  ;;  %v295_v26 = vld [vmem:[%s1950_s3 + $0x128] sm:$0xff] }
  0x32   : > { %1563 = vmatprep.mubr.msk.f32.mxu1 %vm354_vm0, %v278_v49  ;;  %1700 = vmatpush3.bf16.msra.mxu0 %v1697_v39  ;;  %v311_v27 = vld [vmem:[%s1950_s3 + $0x1a8] sm:$0xff]  ;;  %v296_v28 = vld [vmem:[%s1950_s3 + $0x130] sm:$0xff]  ;;  %v297_v30 = vld [vmem:[%s1950_s3 + $0x138] sm:$0xff] }
  0x33   : > { %1716 = vmatpush3.bf16.msra.mxu1 %v1713_v41  ;;  %1702 = vmatprep.subr.bf16.mxu0 %v1701_v50  ;;  %v312_v29 = vld [vmem:[%s1950_s3 + $0x1b0] sm:$0xff]  ;;  %v313_v31 = vld [vmem:[%s1950_s3 + $0x1b8] sm:$0xff]  ;;  %v298_v32 = vld [vmem:[%s1950_s3 + $0x140] sm:$0xff] }
  0x34   : > { %1524 = vmatmul.mubr.msk.f32.gmra.mrb[4].mxu0 %vm354_vm0, %v263_v54  ;;  %1718 = vmatprep.subr.bf16.mxu1 %v1717_v51  ;;  %v314_v33 = vld [vmem:[%s1950_s3 + $0x1c0] sm:$0xff]  ;;  %v299_v34 = vld [vmem:[%s1950_s3 + $0x148] sm:$0xff]  ;;  %v300_v36 = vld [vmem:[%s1950_s3 + $0x150] sm:$0xff] }
  0x35   : > { %1564 = vmatmul.mubr.msk.f32.gmra.mrb[4].mxu1 %vm354_vm0, %v279_v57  ;;  %1526 = vmatprep.mubr.msk.f32.mxu0 %vm354_vm0, %v264_v58  ;;  %v315_v35 = vld [vmem:[%s1950_s3 + $0x1c8] sm:$0xff]  ;;  %v316_v37 = vld [vmem:[%s1950_s3 + $0x1d0] sm:$0xff]  ;;  %v301_v38 = vld [vmem:[%s1950_s3 + $0x158] sm:$0xff] }
  0x36   : > { %1566 = vmatprep.mubr.msk.f32.mxu1 %vm354_vm0, %v280_v59  ;;  %1704 = vmatpush3.bf16.msra.mxu0 %v1701_v50  ;;  %v317_v39 = vld [vmem:[%s1950_s3 + $0x1d8] sm:$0xff]  ;;  %v302_v40 = vld [vmem:[%s1950_s3 + $0x160] sm:$0xff]  ;;  %v303_v42 = vld [vmem:[%s1950_s3 + $0x168] sm:$0xff] }
  0x37   : > { %1720 = vmatpush3.bf16.msra.mxu1 %v1717_v51  ;;  %1706 = vmatprep.subr.bf16.mxu0 %v1705_v60  ;;  %v318_v41 = vld [vmem:[%s1950_s3 + $0x1e0] sm:$0xff]  ;;  %v319_v43 = vld [vmem:[%s1950_s3 + $0x1e8] sm:$0xff]  ;;  %v304_v44 = vld [vmem:[%s1950_s3 + $0x170] sm:$0xff] }
  0x38   : > { %1527 = vmatmul.mubr.msk.f32.gmra.mrb[6].mxu0 %vm354_vm0, %v265_v62  ;;  %1722 = vmatprep.subr.bf16.mxu1 %v1721_v61  ;;  %v320_v45 = vld [vmem:[%s1950_s3 + $0x1f0] sm:$0xff]  ;;  %v305_v46 = vld [vmem:[%s1950_s3 + $0x178] sm:$0xff] }
  0x39   : > { %1567 = vmatmul.mubr.msk.f32.gmra.mrb[6].mxu1 %vm354_vm0, %v281_v63  ;;  %1529 = vmatprep.mubr.msk.f32.mxu0 %vm354_vm0, %v266_v0  ;;  %v321_v47 = vld [vmem:[%s1950_s3 + $0x1f8] sm:$0xff] }
  0x3a   : > { %1569 = vmatprep.mubr.msk.f32.mxu1 %vm354_vm0, %v282_v1  ;;  %1708 = vmatpush3.bf16.msra.mxu0 %v1705_v60 }
  0x3b   : > { %1724 = vmatpush3.bf16.msra.mxu1 %v1721_v61 }
  0x3c   : > { %1530 = vmatmul.mubr.msk.f32.gmra.mrb[8].mxu0 %vm354_vm0, %v267_v2 }
  0x3d   : > { %1570 = vmatmul.mubr.msk.f32.gmra.mrb[8].mxu1 %vm354_vm0, %v283_v3  ;;  %1532 = vmatprep.mubr.msk.f32.mxu0 %vm354_vm0, %v268_v4 }
  0x3e   : > { %1572 = vmatprep.mubr.msk.f32.mxu1 %vm354_vm0, %v284_v5 }
  0x40   : > { %1533 = vmatmul.mubr.msk.f32.gmra.mrb[10].mxu0 %vm354_vm0, %v269_v6 }
  0x41   : > { %1573 = vmatmul.mubr.msk.f32.gmra.mrb[10].mxu1 %vm354_vm0, %v285_v7  ;;  %1535 = vmatprep.mubr.msk.f32.mxu0 %vm354_vm0, %v270_v8 }
  0x42   : > { %1575 = vmatprep.mubr.msk.f32.mxu1 %vm354_vm0, %v286_v9 }
  0x44   : > { %1536 = vmatmul.mubr.msk.f32.gmra.mrb[12].mxu0 %vm354_vm0, %v271_v10 }
  0x45   : > { %1576 = vmatmul.mubr.msk.f32.gmra.mrb[12].mxu1 %vm354_vm0, %v287_v11  ;;  %1538 = vmatprep.mubr.msk.f32.mxu0 %vm354_vm0, %v272_v12 }
  0x46   : > { %1578 = vmatprep.mubr.msk.f32.mxu1 %vm354_vm0, %v288_v13 }
  0x48   : > { %1539 = vmatmul.mubr.msk.f32.gmra.mrb[14].mxu0 %vm354_vm0, %v273_v14 }
  0x49   : > { %1579 = vmatmul.mubr.msk.f32.gmra.mrb[14].mxu1 %vm354_vm0, %v289_v15  ;;  %1597 = vmatprep.mubr.msk.f32.mxu0 %vm354_vm0, %v290_v16 }
  0x4a   : > { %1637 = vmatprep.mubr.msk.f32.mxu1 %vm354_vm0, %v306_v17 }
  0x4c   : > { %1598 = vmatmul.mubr.msk.f32.vlgmr.msra.gmra.mrb[16].mxu0 %vm354_vm0, %v291_v18 }
  0x4d   : > { %1638 = vmatmul.mubr.msk.f32.vlgmr.msra.gmra.mrb[16].mxu1 %vm354_vm0, %v307_v19  ;;  %1600 = vmatprep.mubr.msk.f32.mxu0 %vm354_vm0, %v292_v20 }
  0x4e   : > { %1640 = vmatprep.mubr.msk.f32.mxu1 %vm354_vm0, %v308_v21 }
  0x50   : > { %1601 = vmatmul.mubr.msk.f32.gmra.mrb[18].mxu0 %vm354_vm0, %v293_v22 }
  0x51   : > { %1641 = vmatmul.mubr.msk.f32.gmra.mrb[18].mxu1 %vm354_vm0, %v309_v23  ;;  %1603 = vmatprep.mubr.msk.f32.mxu0 %vm354_vm0, %v294_v24 }
  0x52   : > { %1643 = vmatprep.mubr.msk.f32.mxu1 %vm354_vm0, %v310_v25 }
  0x54   : > { %1604 = vmatmul.mubr.msk.f32.gmra.mrb[20].mxu0 %vm354_vm0, %v295_v26 }
  0x55   : > { %1644 = vmatmul.mubr.msk.f32.gmra.mrb[20].mxu1 %vm354_vm0, %v311_v27  ;;  %1606 = vmatprep.mubr.msk.f32.mxu0 %vm354_vm0, %v296_v28 }
  0x56   : > { %1646 = vmatprep.mubr.msk.f32.mxu1 %vm354_vm0, %v312_v29 }
  0x58   : > { %1607 = vmatmul.mubr.msk.f32.gmra.mrb[22].mxu0 %vm354_vm0, %v297_v30 }
  0x59   : > { %1647 = vmatmul.mubr.msk.f32.gmra.mrb[22].mxu1 %vm354_vm0, %v313_v31  ;;  %1609 = vmatprep.mubr.msk.f32.mxu0 %vm354_vm0, %v298_v32 }
  0x5a   : > { %1649 = vmatprep.mubr.msk.f32.mxu1 %vm354_vm0, %v314_v33 }
  0x5c   : > { %1610 = vmatmul.mubr.msk.f32.gmra.mrb[24].mxu0 %vm354_vm0, %v299_v34 }
  0x5d   : > { %1650 = vmatmul.mubr.msk.f32.gmra.mrb[24].mxu1 %vm354_vm0, %v315_v35  ;;  %1612 = vmatprep.mubr.msk.f32.mxu0 %vm354_vm0, %v300_v36 }
  0x5e   : > { %1652 = vmatprep.mubr.msk.f32.mxu1 %vm354_vm0, %v316_v37 }
  0x60   : > { %1613 = vmatmul.mubr.msk.f32.gmra.mrb[26].mxu0 %vm354_vm0, %v301_v38 }
  0x61   : > { %1653 = vmatmul.mubr.msk.f32.gmra.mrb[26].mxu1 %vm354_vm0, %v317_v39  ;;  %1615 = vmatprep.mubr.msk.f32.mxu0 %vm354_vm0, %v302_v40 }
  0x62   : > { %1655 = vmatprep.mubr.msk.f32.mxu1 %vm354_vm0, %v318_v41 }
  0x64   : > { %1616 = vmatmul.mubr.msk.f32.gmra.mrb[28].mxu0 %vm354_vm0, %v303_v42 }
  0x65   : > { %1656 = vmatmul.mubr.msk.f32.gmra.mrb[28].mxu1 %vm354_vm0, %v319_v43  ;;  %1618 = vmatprep.mubr.msk.f32.mxu0 %vm354_vm0, %v304_v44 }
  0x66   : > { %1658 = vmatprep.mubr.msk.f32.mxu1 %vm354_vm0, %v320_v45 }
  0x68   : > { %1619 = vmatmul.mubr.msk.f32.gmra.mrb[30].mxu0 %vm354_vm0, %v305_v46 }
  0x69   : > { %1659 = vmatmul.mubr.msk.f32.gmra.mrb[30].mxu1 %vm354_vm0, %v321_v47 }
  0xff   : > { %v1519_v48 = vpop.f32.mrb[0].mxu0 }
 0x100   : > { %1128 = vst [vmem:[%s2109_s6 + $0x8] sm:$0xff] %v1519_v48  ;;  %v1559_v49 = vpop.f32.mrb[0].mxu1  ;;  %v469_v50 = vpop.f32.mrb[1].mxu0 }
 0x101   : > { %1144 = vst [vmem:[%s2109_s6 + $0x88] sm:$0xff] %v1559_v49  ;;  %1127 = vst [vmem:[%s2109_s6] sm:$0xff] %v469_v50  ;;  %v662_v51 = vpop.f32.mrb[1].mxu1 }
 0x102   : > { %1143 = vst [vmem:[%s2109_s6 + $0x80] sm:$0xff] %v662_v51 }
 0x103   : > { %v1522_v52 = vpop.f32.mrb[2].mxu0 }
 0x104   : > { %1130 = vst [vmem:[%s2109_s6 + $0x18] sm:$0xff] %v1522_v52  ;;  %v1562_v53 = vpop.f32.mrb[2].mxu1  ;;  %v479_v54 = vpop.f32.mrb[3].mxu0 }
 0x105   : > { %1146 = vst [vmem:[%s2109_s6 + $0x98] sm:$0xff] %v1562_v53  ;;  %1129 = vst [vmem:[%s2109_s6 + $0x10] sm:$0xff] %v479_v54  ;;  %v672_v55 = vpop.f32.mrb[3].mxu1 }
 0x106   : > { %1145 = vst [vmem:[%s2109_s6 + $0x90] sm:$0xff] %v672_v55 }
 0x107   : > { %v1525_v56 = vpop.f32.mrb[4].mxu0 }
 0x108   : > { %1132 = vst [vmem:[%s2109_s6 + $0x28] sm:$0xff] %v1525_v56  ;;  %v1565_v57 = vpop.f32.mrb[4].mxu1  ;;  %v489_v58 = vpop.f32.mrb[5].mxu0 }
 0x109   : > { %1148 = vst [vmem:[%s2109_s6 + $0xa8] sm:$0xff] %v1565_v57  ;;  %1131 = vst [vmem:[%s2109_s6 + $0x20] sm:$0xff] %v489_v58  ;;  %v682_v59 = vpop.f32.mrb[5].mxu1 }
 0x10a   : > { %1147 = vst [vmem:[%s2109_s6 + $0xa0] sm:$0xff] %v682_v59 }
 0x10b   : > { %v1528_v60 = vpop.f32.mrb[6].mxu0 }
 0x10c   : > { %1134 = vst [vmem:[%s2109_s6 + $0x38] sm:$0xff] %v1528_v60  ;;  %v1568_v61 = vpop.f32.mrb[6].mxu1  ;;  %v499_v62 = vpop.f32.mrb[7].mxu0 }
 0x10d   : > { %1150 = vst [vmem:[%s2109_s6 + $0xb8] sm:$0xff] %v1568_v61  ;;  %1133 = vst [vmem:[%s2109_s6 + $0x30] sm:$0xff] %v499_v62  ;;  %v692_v63 = vpop.f32.mrb[7].mxu1 }
 0x10e   : > { %1149 = vst [vmem:[%s2109_s6 + $0xb0] sm:$0xff] %v692_v63 }
 0x10f   : > { %v1531_v0 = vpop.f32.mrb[8].mxu0 }
 0x110   : > { %1136 = vst [vmem:[%s2109_s6 + $0x48] sm:$0xff] %v1531_v0  ;;  %v1571_v1 = vpop.f32.mrb[8].mxu1  ;;  %v509_v2 = vpop.f32.mrb[9].mxu0 }
 0x111   : > { %1152 = vst [vmem:[%s2109_s6 + $0xc8] sm:$0xff] %v1571_v1  ;;  %1135 = vst [vmem:[%s2109_s6 + $0x40] sm:$0xff] %v509_v2  ;;  %v702_v3 = vpop.f32.mrb[9].mxu1 }
 0x112   : > { %1151 = vst [vmem:[%s2109_s6 + $0xc0] sm:$0xff] %v702_v3 }
 0x113   : > { %v1534_v4 = vpop.f32.mrb[10].mxu0 }
 0x114   : > { %1138 = vst [vmem:[%s2109_s6 + $0x58] sm:$0xff] %v1534_v4  ;;  %v1574_v5 = vpop.f32.mrb[10].mxu1  ;;  %v519_v6 = vpop.f32.mrb[11].mxu0 }
 0x115   : > { %1154 = vst [vmem:[%s2109_s6 + $0xd8] sm:$0xff] %v1574_v5  ;;  %1137 = vst [vmem:[%s2109_s6 + $0x50] sm:$0xff] %v519_v6  ;;  %v712_v7 = vpop.f32.mrb[11].mxu1 }
 0x116   : > { %1153 = vst [vmem:[%s2109_s6 + $0xd0] sm:$0xff] %v712_v7 }
 0x117   : > { %v1537_v8 = vpop.f32.mrb[12].mxu0 }
 0x118   : > { %1140 = vst [vmem:[%s2109_s6 + $0x68] sm:$0xff] %v1537_v8  ;;  %v1577_v9 = vpop.f32.mrb[12].mxu1  ;;  %v529_v10 = vpop.f32.mrb[13].mxu0 }
 0x119   : > { %1156 = vst [vmem:[%s2109_s6 + $0xe8] sm:$0xff] %v1577_v9  ;;  %1139 = vst [vmem:[%s2109_s6 + $0x60] sm:$0xff] %v529_v10  ;;  %v722_v11 = vpop.f32.mrb[13].mxu1 }
 0x11a   : > { %1155 = vst [vmem:[%s2109_s6 + $0xe0] sm:$0xff] %v722_v11 }
 0x11b   : > { %v1540_v12 = vpop.f32.mrb[14].mxu0 }
 0x11c   : > { %1142 = vst [vmem:[%s2109_s6 + $0x78] sm:$0xff] %v1540_v12  ;;  %v1580_v13 = vpop.f32.mrb[14].mxu1  ;;  %v539_v14 = vpop.f32.mrb[15].mxu0 }
 0x11d   : > { %1158 = vst [vmem:[%s2109_s6 + $0xf8] sm:$0xff] %v1580_v13  ;;  %1141 = vst [vmem:[%s2109_s6 + $0x70] sm:$0xff] %v539_v14  ;;  %v732_v15 = vpop.f32.mrb[15].mxu1 }
 0x11e   : > { %1157 = vst [vmem:[%s2109_s6 + $0xf0] sm:$0xff] %v732_v15 }
 0x11f   : > { %v1599_v16 = vpop.f32.mrb[16].mxu0 }
 0x120   : > { %1160 = vst [vmem:[%s2109_s6 + $0x108] sm:$0xff] %v1599_v16  ;;  %v1639_v17 = vpop.f32.mrb[16].mxu1  ;;  %v855_v18 = vpop.f32.mrb[17].mxu0 }
 0x121   : > { %1176 = vst [vmem:[%s2109_s6 + $0x188] sm:$0xff] %v1639_v17  ;;  %1159 = vst [vmem:[%s2109_s6 + $0x100] sm:$0xff] %v855_v18  ;;  %v1048_v19 = vpop.f32.mrb[17].mxu1 }
 0x122   : > { %1175 = vst [vmem:[%s2109_s6 + $0x180] sm:$0xff] %v1048_v19 }
 0x123   : > { %v1602_v20 = vpop.f32.mrb[18].mxu0 }
 0x124   : > { %1162 = vst [vmem:[%s2109_s6 + $0x118] sm:$0xff] %v1602_v20  ;;  %v1642_v21 = vpop.f32.mrb[18].mxu1  ;;  %v865_v22 = vpop.f32.mrb[19].mxu0 }
 0x125   : > { %1178 = vst [vmem:[%s2109_s6 + $0x198] sm:$0xff] %v1642_v21  ;;  %1161 = vst [vmem:[%s2109_s6 + $0x110] sm:$0xff] %v865_v22  ;;  %v1058_v23 = vpop.f32.mrb[19].mxu1 }
 0x126   : > { %1177 = vst [vmem:[%s2109_s6 + $0x190] sm:$0xff] %v1058_v23 }
 0x127   : > { %v1605_v24 = vpop.f32.mrb[20].mxu0 }
 0x128   : > { %1164 = vst [vmem:[%s2109_s6 + $0x128] sm:$0xff] %v1605_v24  ;;  %v1645_v25 = vpop.f32.mrb[20].mxu1  ;;  %v875_v26 = vpop.f32.mrb[21].mxu0 }
 0x129   : > { %1180 = vst [vmem:[%s2109_s6 + $0x1a8] sm:$0xff] %v1645_v25  ;;  %1163 = vst [vmem:[%s2109_s6 + $0x120] sm:$0xff] %v875_v26  ;;  %v1068_v27 = vpop.f32.mrb[21].mxu1 }
 0x12a   : > { %1179 = vst [vmem:[%s2109_s6 + $0x1a0] sm:$0xff] %v1068_v27 }
 0x12b   : > { %v1608_v28 = vpop.f32.mrb[22].mxu0 }
 0x12c   : > { %1166 = vst [vmem:[%s2109_s6 + $0x138] sm:$0xff] %v1608_v28  ;;  %v1648_v29 = vpop.f32.mrb[22].mxu1  ;;  %v885_v30 = vpop.f32.mrb[23].mxu0 }
 0x12d   : > { %1182 = vst [vmem:[%s2109_s6 + $0x1b8] sm:$0xff] %v1648_v29  ;;  %1165 = vst [vmem:[%s2109_s6 + $0x130] sm:$0xff] %v885_v30  ;;  %v1078_v31 = vpop.f32.mrb[23].mxu1 }
 0x12e   : > { %1181 = vst [vmem:[%s2109_s6 + $0x1b0] sm:$0xff] %v1078_v31 }
 0x12f   : > { %v1611_v32 = vpop.f32.mrb[24].mxu0 }
 0x130   : > { %1168 = vst [vmem:[%s2109_s6 + $0x148] sm:$0xff] %v1611_v32  ;;  %v1651_v33 = vpop.f32.mrb[24].mxu1  ;;  %v895_v34 = vpop.f32.mrb[25].mxu0 }
 0x131   : > { %1184 = vst [vmem:[%s2109_s6 + $0x1c8] sm:$0xff] %v1651_v33  ;;  %1167 = vst [vmem:[%s2109_s6 + $0x140] sm:$0xff] %v895_v34  ;;  %v1088_v35 = vpop.f32.mrb[25].mxu1 }
 0x132   : > { %1183 = vst [vmem:[%s2109_s6 + $0x1c0] sm:$0xff] %v1088_v35 }
 0x133   : > { %v1614_v36 = vpop.f32.mrb[26].mxu0 }
 0x134   : > { %1170 = vst [vmem:[%s2109_s6 + $0x158] sm:$0xff] %v1614_v36  ;;  %v1654_v37 = vpop.f32.mrb[26].mxu1  ;;  %v905_v38 = vpop.f32.mrb[27].mxu0 }
 0x135   : > { %1186 = vst [vmem:[%s2109_s6 + $0x1d8] sm:$0xff] %v1654_v37  ;;  %1169 = vst [vmem:[%s2109_s6 + $0x150] sm:$0xff] %v905_v38  ;;  %v1098_v39 = vpop.f32.mrb[27].mxu1 }
 0x136   : > { %1185 = vst [vmem:[%s2109_s6 + $0x1d0] sm:$0xff] %v1098_v39 }
 0x137   : > { %v1617_v40 = vpop.f32.mrb[28].mxu0 }
 0x138   : > { %1172 = vst [vmem:[%s2109_s6 + $0x168] sm:$0xff] %v1617_v40  ;;  %v1657_v41 = vpop.f32.mrb[28].mxu1  ;;  %v915_v42 = vpop.f32.mrb[29].mxu0 }
 0x139   : > { %1188 = vst [vmem:[%s2109_s6 + $0x1e8] sm:$0xff] %v1657_v41  ;;  %1171 = vst [vmem:[%s2109_s6 + $0x160] sm:$0xff] %v915_v42  ;;  %v1108_v43 = vpop.f32.mrb[29].mxu1 }
 0x13a   : > { %1187 = vst [vmem:[%s2109_s6 + $0x1e0] sm:$0xff] %v1108_v43 }
 0x13b   : > { %v1620_v44 = vpop.f32.mrb[30].mxu0 }
 0x13c   : > { %1174 = vst [vmem:[%s2109_s6 + $0x178] sm:$0xff] %v1620_v44  ;;  %v1660_v45 = vpop.f32.mrb[30].mxu1  ;;  %v925_v46 = vpop.f32.mrb[31].mxu0 }
 0x13d   : > { %1190 = vst [vmem:[%s2109_s6 + $0x1f8] sm:$0xff] %v1660_v45  ;;  %1173 = vst [vmem:[%s2109_s6 + $0x170] sm:$0xff] %v925_v46  ;;  %v1118_v47 = vpop.f32.mrb[31].mxu1 }
 0x13e   : > { %1189 = vst [vmem:[%s2109_s6 + $0x1f0] sm:$0xff] %v1118_v47 }
 0x13f   : > { %1795 = shalt.err (!%p1792_p5)
}
 0x140   : > { %s1796_s26 = scalar_lea.hbm %s2176_s18, 8192  ;;  %s1800_s29 = scalar_lea.hbm %s2234_s2, 16384 }
 0x141   : > { %p1797_p6 = scmp.ne.s32.totalorder %s2176_s18, %s1796_s26  ;;  %p1801_p10 = scmp.lt.u32.totalorder %s2176_s18, %s2234_s2 }
 0x142   : > { %p1802_p11 = scmp.lt.u32.totalorder %s1800_s29, %s1796_s26  ;;  %p1804_p13 = scmp.lt.u32.totalorder %s1796_s26, %s2176_s18 }
 0x143   : > { %p1798_p7 = pnand %p1797_p6, %p1920_p4 }
 0x144   : > { %p1803_p12 = por %p1802_p11, %p1801_p10 }
 0x145   : > { %p1799_p9 = pneg %p1798_p7 }
 0x146   : > { %p1805_p0 = por %p1804_p13, %p1803_p12 }
 0x148   : > { %p1806_p1 = pnand %p1805_p0, %p1799_p9 }
 0x14a   : > { %1809 = shalt.err (!%p1806_p1)
}
 0x14b   : > { %s1863_s4 = smov 128   ;;  %s1864_s5 = smov 8  }
 0x14c   : > { %1725 = dma.vmem_to_hbm [thread:$0]  (%p1920_p4), %s2178_s8, 8192, %s2176_s18, %s2186_s12, %s1863_s4, %s1863_s4, %s1864_s5  }
 0x14d PF: > { %p1731_p2 = scmp.ge.s32.totalorder %s1860_s14, 2  ;;  %s1224_s6 = sand.u32 1, %s1840_s9  }
 0x14e   : > { %s1225_s7 = scalar_lea.sflag [#allocation3], %s1224_s6 }
 0x14f   : > { %p1728_p3 = pnand %p1731_p2, %p1927_p8 }
 0x151   : > { %1835 = dma.done.wait (!%p1728_p3), %s1225_s7, 8192  }
 0x152   : > { %1837 = vsyncadd (!%p1728_p3), %s1225_s7, 4294959104  ;;  %s15_s14 = sadd.s32 1, %s1860_s14   ;;  %s2237_s9 = smov %s1844_s10 }
 0x153   : > { %p12_p5 = scmp.ge.s32.totalorder %s15_s14, 4   ;;  %s2238_s10 = smov %s1848_s11 }
 0x154   : > { %s2239_s11 = smov %s1933_s22  ;;  %s2240_s12 = smov %s1856_s13 }
 0x155   : > { %s2241_s13 = smov %s2243_s17  ;;  %14 = sbr.rel (!%p12_p5) target bundleno = 4 (0x4), region = 66 }
 0x15c   :  { %1230 = vsyncpa [#allocation3], 1 }
 0x15d   :  { %1232 = vsyncpa [#allocation3 + $0x1], 1 }

</bundles_post_ra>
